<compile_context>
chip_gen: v7x
topology: tpu7x:2x2x1
jax: 0.10.0
libtpu: 0.0.40
codegen_flags: <defaults>
</compile_context>

<pallas_src>
import functools

import jax
import jax.numpy as jnp
from jax import lax
from jax.experimental import pallas as pl
from jax.experimental.pallas import tpu as pltpu

_MIB = 1024 * 1024


def _js_loss_kernel(out_ref, tgt_ref, part_ref, acc_ref, *,
                    n, c, wh, tile, n_seq, mask_spatial, mask_channels, approx):
    # out_ref / tgt_ref: (N*C, TILE) blocks in VMEM (native dtype).
    # part_ref:          (1, 8, 128) f32 lane-dense partial-sum output.
    # acc_ref:           (N*C, 1) f32 accumulator scratch (lane-padded).
    p = pl.program_id(0)
    t = pl.program_id(1)

    @pl.when(t == 0)
    def _init():
        acc_ref[...] = jnp.zeros_like(acc_ref)

    out = out_ref[...].astype(jnp.float32)
    tgt = tgt_ref[...].astype(jnp.float32)

    m = (out + tgt) * 0.5
    inv_m = pl.reciprocal(m, approx=approx)            # EUP slot, ~free
    # q computed directly as tgt/m (always > 0); q = 2 - p could go <= 0 with
    # the approximate reciprocal and poison the log with NaN.
    term = out * jnp.log(out * inv_m) + tgt * jnp.log(tgt * inv_m)

    if mask_spatial:
        # Zero out lanes past the true spatial extent (ragged last tile and/or
        # the overhang step of an uneven 2-core split).  Select discards any
        # NaN/Inf computed from the garbage lanes.
        g = p * n_seq + t                               # intended global tile idx
        start = g * tile
        lane = lax.broadcasted_iota(jnp.int32, term.shape, 1)
        term = jnp.where(start + lane < wh, term, 0.0)

    # Per-tile XLU reduce; VALU/EUP-bound loop makes this a free slot.
    acc_ref[...] += jnp.sum(term, axis=1, keepdims=True)

    @pl.when(t == n_seq - 1)
    def _finalize():
        s = acc_ref[...]                                # (N*C, 1)
        if mask_channels:
            # Only channels 0..80 contribute (0:68 and 68:81 are both summed).
            row = lax.broadcasted_iota(jnp.int32, s.shape, 0)
            s = jnp.where(lax.rem(row, c) < 81, s, 0.0)
        partial = jnp.sum(s) * (1.0 / float(n))         # batch mean folded in
        part_ref[...] = jnp.broadcast_to(partial, part_ref.shape).astype(jnp.float32)


def _vmem_capacity_bytes():
    try:
        return int(pltpu.get_tpu_info().vmem_capacity_bytes)
    except Exception:
        return 64 * _MIB                                 # conservative (v7x per-TC)


def _num_tensorcores():
    """Best-effort TensorCores-per-device (v7x: 2, v5e/v6e: 1). Conservative 1."""
    try:
        info = pltpu.get_tpu_info()
        for name in ("num_cores", "core_count", "num_tensorcores", "tensorcore_count"):
            v = getattr(info, name, None)
            if v:
                return int(v)
    except Exception:
        pass
    return 1


def _vmem_tile_budget_bytes():
    # Budget for the double-buffered input tiles only (accumulator is tiny now).
    # ~28 MiB on 128 MiB-VMEM parts (v5e/v6e), ~21 MiB on v7x's 64 MiB per TC.
    return min(28 * _MIB, _vmem_capacity_bytes() // 3)


def _pick_spatial_tile(wh, nc, in_bytes, budget):
    """Largest spatial tile (128-multiple or full extent) that fits the budget
    with <=10% masked waste."""
    per_lane = 4 * nc * in_bytes           # 2 inputs x 2 pipeline buffers
    cands = [t for t in (8192, 4096, 2048, 1024, 512, 256, 128)
             if t * per_lane <= budget]
    if not cands:
        # TODO(synk): shapes with enormous N*C would also need an N or C grid axis.
        cands = [128]
    if wh <= cands[0]:
        return wh                          # single full-extent block
    best = None
    for t in cands:                        # cands is descending
        nt = pl.cdiv(wh, t)
        eff = wh / float(nt * t)
        if eff >= 0.9:
            return t
        if best is None or eff > best[1]:
            best = (t, eff)
    return best[0]


def my_loss(out_nchw, tgt_nchw, *, approx_reciprocal=True):
    """JAX/Pallas equivalent of myLoss.forward(out, targets).

    Inputs: (N, C, H, W), strictly positive.  Returns a scalar float32 loss.
    """
    n, c, h, w = tgt_nchw.shape
    wh = h * w

    out3 = jnp.reshape(out_nchw, (n, c, wh))           # keep native dtype
    tgt3 = jnp.reshape(tgt_nchw, (n, c, wh))
    # Only channels < 81 contribute.  Pre-slicing costs an HBM copy (3x81 rows of
    # traffic vs 2xC streamed+masked), so only do it when C is materially larger.
    if c > 121:
        out3 = out3[:, :81, :]
        tgt3 = tgt3[:, :81, :]
        c = 81
    nc = n * c
    # Fold N into the sublane axis: one (8,128) padding for the whole slab.
    out2 = jnp.reshape(out3, (nc, wh))
    tgt2 = jnp.reshape(tgt3, (nc, wh))
    in_bytes = max(jnp.dtype(out2.dtype).itemsize, jnp.dtype(tgt2.dtype).itemsize)

    tile = _pick_spatial_tile(wh, nc, in_bytes, _vmem_tile_budget_bytes())
    num_tiles = pl.cdiv(wh, tile)

    # Split spatial tiles across TensorCores when it is free (even tile count)
    # or the chip has 2 TCs (v7x) — an odd count then costs one fully-masked
    # overhang step instead of serializing the whole kernel on one core.
    if num_tiles >= 2 and num_tiles % 2 == 0:
        n_par = 2
    elif num_tiles >= 2 and _num_tensorcores() >= 2:
        n_par = 2
    else:
        n_par = 1
    n_seq = pl.cdiv(num_tiles, n_par)
    mask_spatial = (n_par * n_seq * tile) != wh
    mask_channels = c > 81

    kernel = functools.partial(
        _js_loss_kernel, n=n, c=c, wh=wh, tile=tile, n_seq=n_seq,
        mask_spatial=mask_spatial, mask_channels=mask_channels,
        approx=approx_reciprocal)

    if n_par * n_seq == num_tiles:
        in_map = lambda p, t: (0, p * n_seq + t)
    else:
        # Overhang step re-reads the last valid tile; its contribution is zeroed
        # by the in-kernel spatial mask (which uses the unclamped index).
        in_map = lambda p, t: (0, jnp.minimum(p * n_seq + t, num_tiles - 1))

    elems = nc * wh
    cost = pl.CostEstimate(
        flops=9 * elems,
        transcendentals=3 * elems,                      # reciprocal + 2 logs
        bytes_accessed=2 * elems * in_bytes + n_par * 8 * 128 * 4,
    )

    acc_bytes = ((nc + 7) // 8) * 8 * 128 * 4
    vmem_need = 4 * nc * tile * in_bytes + acc_bytes + 2 * 8 * 128 * 4
    vmem_limit = int(min(max(vmem_need * 5 // 4, 32 * _MIB),
                         _vmem_capacity_bytes() * 3 // 4))

    # TODO(synk): if a v5e profile shows exposed DMA, try pipeline_mode=pl.Buffered(3)
    # on the two input BlockSpecs (do not raise buffering on VMEM-tight v7x).
    partials = pl.pallas_call(
        kernel,
        out_shape=jax.ShapeDtypeStruct((n_par, 8, 128), jnp.float32),
        grid=(n_par, n_seq),
        in_specs=[
            pl.BlockSpec((nc, tile), in_map),
            pl.BlockSpec((nc, tile), in_map),
        ],
        out_specs=pl.BlockSpec((1, 8, 128), lambda p, t: (p, 0, 0)),
        scratch_shapes=[pltpu.VMEM((nc, 1), jnp.float32)],
        compiler_params=pltpu.CompilerParams(
            dimension_semantics=("parallel", "arbitrary"),
            vmem_limit_bytes=vmem_limit),
        cost_estimate=cost,
    )(out2, tgt2)

    # Each parallel program already divided its partial by N; sum the partials.
    return jnp.sum(partials[:, 0, 0])


def _reference_loss(out_nchw, tgt_nchw):
    """Pure-JAX reference mirroring the PyTorch forward exactly."""
    n, c, h, w = tgt_nchw.shape
    out = out_nchw.astype(jnp.float32)
    tgt = tgt_nchw.astype(jnp.float32)
    m = (out + tgt) / 2.0
    tmp = 1.0 / m
    part_a = (out * jnp.log(out * tmp)).reshape(n, c, h * w).sum(axis=2)
    part_b = (tgt * jnp.log(tgt * tmp)).reshape(n, c, h * w).sum(axis=2)
    a = part_a[:, 0:68] + part_b[:, 0:68]
    b = part_a[:, 68:81] + part_b[:, 68:81]
    return a.sum(axis=1).mean(axis=0) + b.sum(axis=1).mean(axis=0)


if __name__ == "__main__":
    key = jax.random.PRNGKey(0)
    k1, k2, k3, k4, k5, k6 = jax.random.split(key, 6)

    # Test 1: smallest legal shape (the forward slices 0:68 / 68:81 => C >= 81),
    # f32, spatial smaller than one lane tile (single full-extent block).
    N, C, H, W = 2, 81, 8, 8
    out_x = jax.random.uniform(k1, (N, C, H, W), jnp.float32, minval=0.05, maxval=1.0)
    tgt_x = jax.random.uniform(k2, (N, C, H, W), jnp.float32, minval=0.05, maxval=1.0)
    loss1 = jax.block_until_ready(my_loss(out_x, tgt_x))
    ref1 = jax.block_until_ready(_reference_loss(out_x, tgt_x))
    assert jnp.allclose(loss1, ref1, rtol=5e-3, atol=1e-3), (loss1, ref1)

    # Test 2: bf16, C > 81 (channel mask), wh = 9216 -> tile 2048 x 5 tiles
    # (odd count) exercising the ragged-tile in-kernel spatial mask.
    N2, C2, H2, W2 = 2, 83, 96, 96
    out_y = jax.random.uniform(k3, (N2, C2, H2, W2), jnp.float32,
                               minval=0.05, maxval=1.0).astype(jnp.bfloat16)
    tgt_y = jax.random.uniform(k4, (N2, C2, H2, W2), jnp.float32,
                               minval=0.05, maxval=1.0).astype(jnp.bfloat16)
    loss2 = jax.block_until_ready(my_loss(out_y, tgt_y))
    ref2 = jax.block_until_ready(_reference_loss(out_y, tgt_y))
    assert jnp.allclose(loss2, ref2, rtol=1e-2, atol=1e-2), (loss2, ref2)

    # Test 3: bf16, wh = 16384 -> tile 8192 x 2 tiles, exercising the two-way
    # parallel split and partial-sum combination.
    N3, C3, H3, W3 = 2, 83, 128, 128
    out_z = jax.random.uniform(k5, (N3, C3, H3, W3), jnp.float32,
                               minval=0.05, maxval=1.0).astype(jnp.bfloat16)
    tgt_z = jax.random.uniform(k6, (N3, C3, H3, W3), jnp.float32,
                               minval=0.05, maxval=1.0).astype(jnp.bfloat16)
    loss3 = jax.block_until_ready(my_loss(out_z, tgt_z))
    ref3 = jax.block_until_ready(_reference_loss(out_z, tgt_z))
    assert jnp.allclose(loss3, ref3, rtol=1e-2, atol=1e-2), (loss3, ref3)

    print("KERNEL_OK")
</pallas_src>

<mosaic_0001>
module attributes {stable_mosaic.version = 11 : i64} {
  func.func @_js_loss_kernel(%arg0: i32, %arg1: i32, %arg2: memref<162x64xf32, #tpu.memory_space<vmem>>, %arg3: memref<162x64xf32, #tpu.memory_space<vmem>>, %arg4: memref<1x8x128xf32, #tpu.memory_space<vmem>>, %arg5: memref<162x1xf32, #tpu.memory_space<vmem>>) attributes {dimension_semantics = [#tpu.dimension_semantics<parallel>, #tpu.dimension_semantics<arbitrary>], iteration_bounds = array<i64: 1, 1>, scalar_prefetch = 0 : i64, scratch_operands = 1 : i64, tpu.core_type = #tpu.core_type<tc>, window_params = [{transform_indices = @transform_0, window_bounds = array<i64: 162, 64>}, {transform_indices = @transform_1, window_bounds = array<i64: 162, 64>}, {transform_indices = @transform_2, window_bounds = array<i64: 1, 8, 128>}]} {
    %c0_i32 = arith.constant 0 : i32
    %0 = arith.cmpi eq, %arg1, %c0_i32 : i32
    %1 = arith.extui %0 : i1 to i32
    %c0_i32_0 = arith.constant 0 : i32
    %2 = arith.cmpi ne, %1, %c0_i32_0 : i32
    scf.if %2 {
      %cst_11 = arith.constant 0.000000e+00 : f32
      %24 = vector.broadcast %cst_11 : f32 to vector<162x1xf32>
      %c0_12 = arith.constant 0 : index
      %c0_13 = arith.constant 0 : index
      %25 = vector.load %arg5[%c0_12, %c0_13] : memref<162x1xf32, #tpu.memory_space<vmem>>, vector<162x1xf32>
      tpu.vector_store %arg5[%c0_12, %c0_13], %24 {strides = array<i32>} : memref<162x1xf32, #tpu.memory_space<vmem>>, vector<162x1xf32>,
    } else {
    }
    %c0 = arith.constant 0 : index
    %c0_1 = arith.constant 0 : index
    %3 = vector.load %arg2[%c0, %c0_1] : memref<162x64xf32, #tpu.memory_space<vmem>>, vector<162x64xf32>
    %c0_2 = arith.constant 0 : index
    %c0_3 = arith.constant 0 : index
    %4 = vector.load %arg3[%c0_2, %c0_3] : memref<162x64xf32, #tpu.memory_space<vmem>>, vector<162x64xf32>
    %5 = arith.addf %3, %4 : vector<162x64xf32>
    %cst = arith.constant 5.000000e-01 : f32
    %6 = vector.broadcast %cst : f32 to vector<162x64xf32>
    %7 = arith.mulf %5, %6 : vector<162x64xf32>
    %8 = tpu.reciprocal %7 {approx = true} : vector<162x64xf32> -> vector<162x64xf32>
    %9 = arith.mulf %3, %8 : vector<162x64xf32>
    %10 = math.log %9 : vector<162x64xf32>
    %11 = arith.mulf %3, %10 : vector<162x64xf32>
    %12 = arith.mulf %4, %8 : vector<162x64xf32>
    %13 = math.log %12 : vector<162x64xf32>
    %14 = arith.mulf %4, %13 : vector<162x64xf32>
    %15 = arith.addf %11, %14 : vector<162x64xf32>
    %c0_4 = arith.constant 0 : index
    %c0_5 = arith.constant 0 : index
    %16 = vector.load %arg5[%c0_4, %c0_5] : memref<162x1xf32, #tpu.memory_space<vmem>>, vector<162x1xf32>
    %cst_6 = arith.constant dense<0.000000e+00> : vector<162xf32>
    %17 = vector.multi_reduction <add>, %15, %cst_6 [1] : vector<162x64xf32> to vector<162xf32>
    %18 = vector.shape_cast %17 : vector<162xf32> to vector<162x1xf32>
    %19 = arith.addf %16, %18 : vector<162x1xf32>
    %c0_7 = arith.constant 0 : index
    %c0_8 = arith.constant 0 : index
    %20 = vector.load %arg5[%c0_7, %c0_8] : memref<162x1xf32, #tpu.memory_space<vmem>>, vector<162x1xf32>
    tpu.vector_store %arg5[%c0_7, %c0_8], %19 {strides = array<i32>} : memref<162x1xf32, #tpu.memory_space<vmem>>, vector<162x1xf32>,
    %c0_i32_9 = arith.constant 0 : i32
    %21 = arith.cmpi eq, %arg1, %c0_i32_9 : i32
    %22 = arith.extui %21 : i1 to i32
    %c0_i32_10 = arith.constant 0 : i32
    %23 = arith.cmpi ne, %22, %c0_i32_10 : i32
    scf.if %23 {
      %c0_11 = arith.constant 0 : index
      %c0_12 = arith.constant 0 : index
      %24 = vector.load %arg5[%c0_11, %c0_12] : memref<162x1xf32, #tpu.memory_space<vmem>>, vector<162x1xf32>
      %25 = vector.shape_cast %24 : vector<162x1xf32> to vector<1x162x1xf32>
      %cst_13 = arith.constant dense<0.000000e+00> : vector<1xf32>
      %26 = vector.multi_reduction <add>, %25, %cst_13 [1, 2] : vector<1x162x1xf32> to vector<1xf32>
      %27 = vector.shape_cast %26 : vector<1xf32> to vector<1x1x1xf32>
      %28 = vector.extract %27[0, 0, 0] : f32 from vector<1x1x1xf32>
      %cst_14 = arith.constant 5.000000e-01 : f32
      %29 = arith.mulf %28, %cst_14 : f32
      %30 = vector.broadcast %29 : f32 to vector<1x8x128xf32>
      %c0_15 = arith.constant 0 : index
      %c0_16 = arith.constant 0 : index
      %c0_17 = arith.constant 0 : index
      %31 = vector.load %arg4[%c0_15, %c0_16, %c0_17] : memref<1x8x128xf32, #tpu.memory_space<vmem>>, vector<1x8x128xf32>
      tpu.vector_store %arg4[%c0_15, %c0_16, %c0_17], %30 {strides = array<i32>} : memref<1x8x128xf32, #tpu.memory_space<vmem>>, vector<1x8x128xf32>,
    } else {
    }
    return
  }
  func.func @transform_0(%arg0: i32, %arg1: i32) -> (i32, i32) {
    %c1_i32 = arith.constant 1 : i32
    %0 = arith.muli %arg0, %c1_i32 : i32
    %1 = arith.addi %0, %arg1 : i32
    %c0_i32 = arith.constant 0 : i32
    %c0_i32_0 = arith.constant 0 : i32
    return %c0_i32, %1 : i32, i32
  }
  func.func @transform_1(%arg0: i32, %arg1: i32) -> (i32, i32) {
    %c1_i32 = arith.constant 1 : i32
    %0 = arith.muli %arg0, %c1_i32 : i32
    %1 = arith.addi %0, %arg1 : i32
    %c0_i32 = arith.constant 0 : i32
    %c0_i32_0 = arith.constant 0 : i32
    return %c0_i32, %1 : i32, i32
  }
  func.func @transform_2(%arg0: i32, %arg1: i32) -> (i32, i32, i32) {
    %c0_i32 = arith.constant 0 : i32
    %c0_i32_0 = arith.constant 0 : i32
    %c0_i32_1 = arith.constant 0 : i32
    return %arg0, %c0_i32, %c0_i32_0 : i32, i32, i32
  }
}

</mosaic_0001>

<bundles_post_ra>
// kernel: tpu_custom_call.1
= control target key start
LH: loop header
LB: loop body
LE: loop exit
PB: predicated region body
PF: predicated region fallthrough
CT: control target
= control target key end

     0   :  { %s1250_s0 = inlined_call_operand.vmem [shape: f32[162,64], index: 0, kind: input, shape index: {}]   ;;  %s1251_s1 = inlined_call_operand.vmem [shape: f32[162,64], index: 1, kind: input, shape index: {}]   ;;  %s1252_s2 = inlined_call_operand.hbm [shape: f32[1,8,128], index: 2, kind: output, shape index: {}]  }
   0x1   :  { %v774_v0 = vld [vmem:[%s1250_s0] sm:$0xff]  ;;  %v784_v2 = vld [vmem:[%s1250_s0 + $0x10] sm:$0xff]  ;;  %v796_v5 = vld [vmem:[%s1250_s0 + $0x8] sm:$0xff] }
   0x2   :  { %v779_v1 = vld [vmem:[%s1251_s1] sm:$0xff]  ;;  %v791_v4 = vld [vmem:[%s1251_s1 + $0x10] sm:$0xff]  ;;  %v801_v6 = vld [vmem:[%s1251_s1 + $0x8] sm:$0xff] }
   0x3   :  { %v115_v3 = vadd.f32 %v779_v1, %v774_v0  ;;  %v117_v7 = vadd.f32 %v791_v4, %v784_v2  ;;  %v116_v8 = vadd.f32 %v801_v6, %v796_v5  ;;  %v810_v9 = vld [vmem:[%s1250_s0 + $0x18] sm:$0xff]  ;;  %v820_v11 = vld [vmem:[%s1250_s0 + $0x20] sm:$0xff]  ;;  %v832_v15 = vld [vmem:[%s1250_s0 + $0x28] sm:$0xff] }
   0x4   :  { %v815_v10 = vld [vmem:[%s1251_s1 + $0x18] sm:$0xff]  ;;  %v827_v14 = vld [vmem:[%s1251_s1 + $0x20] sm:$0xff]  ;;  %v837_v16 = vld [vmem:[%s1251_s1 + $0x28] sm:$0xff] }
   0x5   :  { %v136_v12 = vmul.f32 0.5, %v115_v3  ;;  %v118_v13 = vadd.f32 %v815_v10, %v810_v9  ;;  %v138_v17 = vmul.f32 0.5, %v117_v7  ;;  %v137_v18 = vmul.f32 0.5, %v116_v8  ;;  %v846_v21 = vld [vmem:[%s1250_s0 + $0x30] sm:$0xff]  ;;  %v856_v23 = vld [vmem:[%s1250_s0 + $0x38] sm:$0xff]  ;;  %v868_v27 = vld [vmem:[%s1250_s0 + $0x40] sm:$0xff] }
   0x6   :  { %v119_v19 = vadd.f32 %v827_v14, %v820_v11  ;;  %v120_v20 = vadd.f32 %v837_v16, %v832_v15  ;;  %v851_v22 = vld [vmem:[%s1251_s1 + $0x30] sm:$0xff]  ;;  %v863_v26 = vld [vmem:[%s1251_s1 + $0x38] sm:$0xff]  ;;  %v873_v28 = vld [vmem:[%s1251_s1 + $0x40] sm:$0xff] }
   0x7   :  { %604 = vrcp.f32 %v136_v12  ;;  %v139_v24 = vmul.f32 0.5, %v118_v13  ;;  %v121_v25 = vadd.f32 %v851_v22, %v846_v21  ;;  %v122_v31 = vadd.f32 %v863_v26, %v856_v23  ;;  %v880_v32 = vld [vmem:[%s1250_s0 + $0x48] sm:$0xff]  ;;  %v890_v34 = vld [vmem:[%s1250_s0 + $0x50] sm:$0xff]  ;;  %v904_v39 = vld [vmem:[%s1250_s0 + $0x58] sm:$0xff] }
   0x8   :  { %606 = vrcp.f32 %v138_v17  ;;  %v140_v29 = vmul.f32 0.5, %v119_v19  ;;  %v141_v30 = vmul.f32 0.5, %v120_v20  ;;  %v885_v33 = vld [vmem:[%s1251_s1 + $0x48] sm:$0xff]  ;;  %v123_v36 = vadd.f32 %v873_v28, %v868_v27  ;;  %v899_v38 = vld [vmem:[%s1251_s1 + $0x50] sm:$0xff]  ;;  %v909_v40 = vld [vmem:[%s1251_s1 + $0x58] sm:$0xff] }
   0x9   :  { %608 = vrcp.f32 %v137_v18  ;;  %v142_v35 = vmul.f32 0.5, %v121_v25  ;;  %v124_v37 = vadd.f32 %v885_v33, %v880_v32  ;;  %v143_v41 = vmul.f32 0.5, %v122_v31  ;;  %v918_v44 = vld [vmem:[%s1250_s0 + $0x60] sm:$0xff] }
   0xa   :  { %610 = vrcp.f32 %v139_v24  ;;  %v125_v42 = vadd.f32 %v899_v38, %v890_v34  ;;  %v126_v43 = vadd.f32 %v909_v40, %v904_v39  ;;  %v923_v45 = vld [vmem:[%s1251_s1 + $0x60] sm:$0xff]  ;;  %v144_v46 = vmul.f32 0.5, %v123_v36 }
   0xb   :  { %612 = vrcp.f32 %v140_v29  ;;  %v127_v47 = vadd.f32 %v923_v45, %v918_v44  ;;  %v145_v48 = vmul.f32 0.5, %v124_v37 }
   0xc   :  { %614 = vrcp.f32 %v141_v30  ;;  %v146_v49 = vmul.f32 0.5, %v125_v42  ;;  %v147_v50 = vmul.f32 0.5, %v126_v43 }
   0xd   :  { %616 = vrcp.f32 %v142_v35  ;;  %v148_v51 = vmul.f32 0.5, %v127_v47 }
   0xe   :  { %618 = vrcp.f32 %v143_v41 }
   0xf   :  { %620 = vrcp.f32 %v144_v46 }
  0x10   :  { %622 = vrcp.f32 %v145_v48 }
  0x11   :  { %7 = vsyncpa [#allocation4], 0  ;;  %v605_v52 = vpop.eup %604  ;;  %624 = vrcp.f32 %v146_v49  ;;  %v938_v12 = vld [vmem:[%s1250_s0 + $0x68] sm:$0xff]  ;;  %v953_v30 = vld [vmem:[%s1250_s0 + $0x70] sm:$0xff]  ;;  %vm388_vm0 = vcmask 523264   ;;  %vm50_vm1 = vcmask 7168  }
  0x12   :  { %v607_v53 = vpop.eup %606  ;;  %v178_v54 = vmul.f32 %v605_v52, %v774_v0  ;;  %v262_v55 = vmul.f32 %v605_v52, %v779_v1  ;;  %626 = vrcp.f32 %v147_v50  ;;  %v943_v13 = vld [vmem:[%s1251_s1 + $0x68] sm:$0xff]  ;;  %v958_v31 = vld [vmem:[%s1251_s1 + $0x70] sm:$0xff]  ;;  %v966_v37 = vld [vmem:[%s1250_s0 + $0x78] sm:$0xff]  ;;  %vm449_vm2 = vcmask 517120  }
  0x13   :  { %v609_v56 = vpop.eup %608  ;;  %v180_v57 = vmul.f32 %v607_v53, %v784_v2  ;;  %v264_v58 = vmul.f32 %v607_v53, %v791_v4  ;;  %628 = vrcp.f32 %v148_v51  ;;  %v128_v29 = vadd.f32 %v943_v13, %v938_v12  ;;  %v971_v41 = vld [vmem:[%s1251_s1 + $0x78] sm:$0xff]  ;;  %v979_v46 = vld [vmem:[%s1250_s0 + $0x80] sm:$0xff]  ;;  %v994_v51 = vld [vmem:[%s1250_s0 + $0x88] sm:$0xff] }
  0x14   :  { %v611_v59 = vpop.eup %610  ;;  %630 = vlog2.f32 %v178_v54  ;;  %v179_v60 = vmul.f32 %v609_v56, %v796_v5  ;;  %v263_v62 = vmul.f32 %v609_v56, %v801_v6  ;;  %v984_v47 = vld [vmem:[%s1251_s1 + $0x80] sm:$0xff]  ;;  %v129_v50 = vadd.f32 %v958_v31, %v953_v30  ;;  %1257 = vst [vmem:[#allocation6_spill] sm:$0xff] %v994_v51  ;;  %v999_v52 = vld [vmem:[%s1251_s1 + $0x88] sm:$0xff] }
  0x15   :  { %v613_v61 = vpop.eup %612  ;;  %632 = vlog2.f32 %v262_v55  ;;  %v181_v3 = vmul.f32 %v611_v59, %v810_v9  ;;  %v265_v8 = vmul.f32 %v611_v59, %v815_v10  ;;  %1258 = vst [vmem:[#allocation7_spill] sm:$0xff] %v999_v52  ;;  %v1002_v55 = vmul.f32 0.5, %v128_v29 }
  0x16   :  { %v615_v63 = vpop.eup %614  ;;  %634 = vlog2.f32 %v180_v57  ;;  %v182_v18 = vmul.f32 %v613_v61, %v820_v11  ;;  %v266_v20 = vmul.f32 %v613_v61, %v827_v14  ;;  %v1006_v56 = vadd.f32 %v971_v41, %v966_v37 }
  0x17   :  { %v617_v7 = vpop.eup %616  ;;  %636 = vlog2.f32 %v264_v58  ;;  %v183_v25 = vmul.f32 %v615_v63, %v832_v15  ;;  %v267_v36 = vmul.f32 %v615_v63, %v837_v16  ;;  %vm71_vm3 = vcmask 1024  }
  0x18   :  { %v619_v17 = vpop.eup %618  ;;  %638 = vlog2.f32 %v179_v60  ;;  %v184_v43 = vmul.f32 %v617_v7, %v846_v21  ;;  %v268_v49 = vmul.f32 %v617_v7, %v851_v22  ;;  %v1011_v60 = vadd.f32 %v984_v47, %v979_v46 }
  0x19   :  { %v621_v19 = vpop.eup %620  ;;  %640 = vlog2.f32 %v263_v62  ;;  %v185_v54 = vmul.f32 %v619_v17, %v856_v23  ;;  %v269_v59 = vmul.f32 %v619_v17, %v863_v26 }
  0x1a   :  { %v623_v24 = vpop.eup %622  ;;  %642 = vlog2.f32 %v181_v3  ;;  %v186_v63 = vmul.f32 %v621_v19, %v868_v27  ;;  %v1016_v3 = vadd.f32 %v999_v52, %v994_v51  ;;  %v270_v17 = vmul.f32 %v621_v19, %v873_v28 }
  0x1b   :  { %v960_v35 = vpop.eup %624  ;;  %644 = vlog2.f32 %v265_v8  ;;  %v187_v52 = vmul.f32 %v623_v24, %v880_v32 }
  0x1c   :  { %v973_v42 = vpop.eup %626  ;;  %646 = vlog2.f32 %v182_v18 }
  0x1d   :  { %v986_v48 = vpop.eup %628  ;;  %648 = vlog2.f32 %v266_v20 }
  0x1e   :  { %v631_v53 = vpop.eup %630  ;;  %650 = vlog2.f32 %v183_v25 }
  0x1f   :  { %v633_v57 = vpop.eup %632  ;;  %v200_v58 = vmul.f32 0.6931472, %v631_v53  ;;  %652 = vlog2.f32 %v267_v36  ;;  %v1021_v36 = vmul.f32 0.5, %v129_v50  ;;  %v271_v50 = vmul.f32 %v623_v24, %v885_v33 }
  0x20   :  { %v635_v61 = vpop.eup %634  ;;  %v284_v62 = vmul.f32 0.6931472, %v633_v57  ;;  %654 = vlog2.f32 %v184_v43 }
  0x21   :  { %v637_v7 = vpop.eup %636  ;;  %v241_v8 = vmul.f32 %v200_v58, %v774_v0  ;;  %v204_v18 = vmul.f32 0.6931472, %v635_v61  ;;  %656 = vlog2.f32 %v268_v49 }
  0x22   :  { %v639_v20 = vpop.eup %638  ;;  %v325_v25 = vmul.f32 %v284_v62, %v779_v1  ;;  %v288_v29 = vmul.f32 0.6931472, %v637_v7  ;;  %658 = vlog2.f32 %v185_v54 }
  0x23   :  { %v641_v43 = vpop.eup %640  ;;  %v243_v53 = vmul.f32 %v204_v18, %v784_v2  ;;  %v202_v57 = vmul.f32 0.6931472, %v639_v20  ;;  %660 = vlog2.f32 %v269_v59 }
  0x24   :  { %v643_v51 = vpop.eup %642  ;;  %v346_v0 = vadd.f32 %v325_v25, %v241_v8  ;;  %v327_v49 = vmul.f32 %v288_v29, %v791_v4  ;;  %v286_v58 = vmul.f32 0.6931472, %v641_v43  ;;  %662 = vlog2.f32 %v186_v63 }
  0x25   :  { %v645_v19 = vpop.eup %644  ;;  %v242_v1 = vmul.f32 %v202_v57, %v796_v5  ;;  %v206_v61 = vmul.f32 0.6931472, %v643_v51  ;;  %664 = vlog2.f32 %v270_v17  ;;  %v188_v5 = vmul.f32 %v960_v35, %v890_v34 }
  0x26   :  { %v647_v54 = vpop.eup %646  ;;  %v389_v2 = vsel %vm388_vm0, %v346_v0, 0.0  ;;  %v348_v62 = vadd.f32 %v327_v49, %v243_v53  ;;  %v326_v59 = vmul.f32 %v286_v58, %v801_v6  ;;  %v290_v7 = vmul.f32 0.6931472, %v645_v19 }
  0x27   :  { %v649_v18 = vpop.eup %648  ;;  %390 = vadd.xlane.f32.xlu0 %v389_v2  ;;  %v244_v4 = vmul.f32 %v206_v61, %v810_v9  ;;  %v208_v8 = vmul.f32 0.6931472, %v647_v54  ;;  %666 = vlog2.f32 %v187_v52  ;;  %v272_v9 = vmul.f32 %v960_v35, %v899_v38 }
  0x28   :  { %v651_v51 = vpop.eup %650  ;;  %v395_v63 = vsel %vm388_vm0, %v348_v62, 0.0  ;;  %v347_v24 = vadd.f32 %v326_v59, %v242_v1  ;;  %v328_v17 = vmul.f32 %v290_v7, %v815_v10  ;;  %v292_v20 = vmul.f32 0.6931472, %v649_v18 }
  0x29   :  { %v653_v25 = vpop.eup %652  ;;  %396 = vadd.xlane.f32.xlu1 %v395_v63  ;;  %v245_v6 = vmul.f32 %v208_v8, %v820_v11  ;;  %v210_v29 = vmul.f32 0.6931472, %v651_v51  ;;  %668 = vlog2.f32 %v271_v50  ;;  %v189_v11 = vmul.f32 %v973_v42, %v904_v39 }
  0x2a   :  { %v655_v52 = vpop.eup %654  ;;  %v392_v43 = vsel %vm388_vm0, %v347_v24, 0.0  ;;  %v349_v53 = vadd.f32 %v328_v17, %v244_v4  ;;  %v329_v57 = vmul.f32 %v292_v20, %v827_v14  ;;  %v294_v0 = vmul.f32 0.6931472, %v653_v25 }
  0x2b   :  { %v657_v49 = vpop.eup %656  ;;  %393 = vadd.xlane.f32.xlu0 %v392_v43  ;;  %v246_v10 = vmul.f32 %v210_v29, %v832_v15  ;;  %v212_v58 = vmul.f32 0.6931472, %v655_v52  ;;  %670 = vlog2.f32 %v188_v5  ;;  %v273_v15 = vmul.f32 %v973_v42, %v909_v40  ;;  %v1074_v43 = vld [vmem:[%s1250_s0 + $0x98] sm:$0xff] }
  0x2c   :  { %v659_v19 = vpop.eup %658  ;;  %v398_v1 = vsel %vm388_vm0, %v349_v53, 0.0  ;;  %v350_v35 = vadd.f32 %v329_v57, %v245_v6  ;;  %v330_v61 = vmul.f32 %v294_v0, %v837_v16  ;;  %v296_v50 = vmul.f32 0.6931472, %v657_v49  ;;  %v1088_v57 = vld [vmem:[%s1250_s0 + $0xa0] sm:$0x3] }
  0x2d   :  { %v661_v54 = vpop.eup %660  ;;  %399 = vadd.xlane.f32.xlu1 %v398_v1  ;;  %v247_v14 = vmul.f32 %v212_v58, %v846_v21  ;;  %v214_v2 = vmul.f32 0.6931472, %v659_v19  ;;  %672 = vlog2.f32 %v272_v9  ;;  %v190_v21 = vmul.f32 %v986_v48, %v918_v44 }
  0x2e   :  { %v663_v62 = vpop.eup %662  ;;  %v401_v59 = vsel %vm388_vm0, %v350_v35, 0.0  ;;  %v351_v7 = vadd.f32 %v330_v61, %v246_v10  ;;  %v331_v18 = vmul.f32 %v296_v50, %v851_v22  ;;  %v298_v4 = vmul.f32 0.6931472, %v661_v54  ;;  %v1058_v22 = vld [vmem:[%s1250_s0 + $0x90] sm:$0xff]  ;;  %s755_s0 = smov [#allocation3]  }
  0x2f   :  { %v665_v8 = vpop.eup %664  ;;  %402 = vadd.xlane.f32.xlu0 %v401_v59  ;;  %v248_v16 = vmul.f32 %v214_v2, %v856_v23  ;;  %v216_v5 = vmul.f32 0.6931472, %v663_v62  ;;  %674 = vlog2.f32 %v189_v11  ;;  %v1063_v23 = vld [vmem:[%s1251_s1 + $0x90] sm:$0xff]  ;;  %v274_v25 = vmul.f32 %v986_v48, %v923_v45 }
  0x30   :  { %v404_v51 = vsel %vm388_vm0, %v351_v7, 0.0  ;;  %v352_v63 = vadd.f32 %v331_v18, %v247_v14  ;;  %v332_v42 = vmul.f32 %v298_v4, %v863_v26  ;;  %v300_v24 = vmul.f32 0.6931472, %v665_v8 }
  0x31   :  { %v667_v17 = vpop.eup %666  ;;  %405 = vadd.xlane.f32.xlu1 %v404_v51  ;;  %v249_v20 = vmul.f32 %v216_v5, %v868_v27  ;;  %676 = vlog2.f32 %v273_v15  ;;  %v151_v26 = vmul.f32 0.5, %v1006_v56  ;;  %v1079_v27 = vld [vmem:[%s1251_s1 + $0x98] sm:$0xff]  ;;  %v152_v48 = vmul.f32 0.5, %v1011_v60  ;;  %v1095_v60 = vld [vmem:[%s1251_s1 + $0xa0] sm:$0x3]  ;;  %s580_s1 = sshll.u32 %s755_s0, 4  ;;  %s581_s1 = int_to_ptr.vmem [resolvable:$true] %s580_s1 }
  0x32   :  { %v407_v6 = vsel %vm388_vm0, %v352_v63, 0.0  ;;  %v353_v29 = vadd.f32 %v332_v42, %v248_v16  ;;  %v333_v9 = vmul.f32 %v300_v24, %v873_v28  ;;  %v218_v52 = vmul.f32 0.6931472, %v667_v17  ;;  %s730_s11 = scalar_lea.vmem %s581_s1, 128  ;;  %p735_p1 = scmp.lt.s32.totalorder %s581_s1, %s581_s1 }
  0x33   :  { %v669_v53 = vpop.eup %668  ;;  %408 = vadd.xlane.f32.xlu0 %v407_v6  ;;  %678 = vlog2.f32 %v190_v21  ;;  %v153_v56 = vmul.f32 0.5, %v1016_v3  ;;  %v133_v28 = vadd.f32 %v1063_v23, %v1058_v22  ;;  %v134_v11 = vadd.f32 %v1079_v27, %v1074_v43  ;;  %p731_p0 = scmp.ne.s32.totalorder %s581_s1, %s730_s11  ;;  %p736_p2 = scmp.lt.s32.totalorder %s730_s11, %s730_s11 }
  0x34   :  { %v410_v0 = vsel %vm388_vm0, %v353_v29, 0.0  ;;  %v354_v49 = vadd.f32 %v333_v9, %v249_v20  ;;  %v250_v10 = vmul.f32 %v218_v52, %v880_v32  ;;  %v302_v58 = vmul.f32 0.6931472, %v669_v53 }
  0x35   :  { %v671_v3 = vpop.eup %670  ;;  %411 = vadd.xlane.f32.xlu1 %v410_v0  ;;  %680 = vlog2.f32 %v274_v25  ;;  %v754_v32 = vmov 0.0   ;;  %v135_v61 = vadd.f32 %v1095_v60, %v1088_v57  ;;  %v155_v15 = vmul.f32 0.5, %v134_v11  ;;  %v1260_v11 = vld [vmem:[#allocation7_spill] sm:$0xff]  ;;  %p737_p3 = por %p736_p2, %p735_p1 }
  0x36   :  { %v413_v19 = vsel %vm388_vm0, %v354_v49, 0.0  ;;  %v334_v1 = vmul.f32 %v302_v58, %v885_v33  ;;  %v220_v35 = vmul.f32 0.6931472, %v671_v3  ;;  %682 = vrcp.f32 %v1002_v55  ;;  %51 = vst.msk [vmem:[#allocation2] sm:$0xff] %vm50_vm1, %v754_v32  ;;  %52 = vst.msk [vmem:[#allocation2 + $0x8] sm:$0xff] %vm50_vm1, %v754_v32 }
  0x37   :  { %53 = vst.msk [vmem:[#allocation2 + $0x10] sm:$0xff] %vm50_vm1, %v754_v32  ;;  %54 = vst.msk [vmem:[#allocation2 + $0x18] sm:$0xff] %vm50_vm1, %v754_v32  ;;  %v673_v33 = vpop.eup %672  ;;  %414 = vadd.xlane.f32.xlu0 %v413_v19  ;;  %684 = vrcp.f32 %v1021_v36  ;;  %v154_v55 = vmul.f32 0.5, %v133_v28  ;;  %v156_v36 = vmul.f32 0.5, %v135_v61  ;;  %p738_p4 = pnand %p737_p3, %p731_p0 }
  0x38   :  { %55 = vst.msk [vmem:[#allocation2 + $0x20] sm:$0xff] %vm50_vm1, %v754_v32  ;;  %56 = vst.msk [vmem:[#allocation2 + $0x28] sm:$0xff] %vm50_vm1, %v754_v32  ;;  %v355_v50 = vadd.f32 %v334_v1, %v250_v10  ;;  %v251_v54 = vmul.f32 %v220_v35, %v890_v34  ;;  %v304_v14 = vmul.f32 0.6931472, %v673_v33  ;;  %686 = vrcp.f32 %v151_v26  ;;  %v1259_v10 = vld [vmem:[#allocation6_spill] sm:$0xff] }
  0x39   :  { %57 = vst.msk [vmem:[#allocation2 + $0x30] sm:$0xff] %vm50_vm1, %v754_v32  ;;  %58 = vst.msk [vmem:[#allocation2 + $0x38] sm:$0xff] %vm50_vm1, %v754_v32  ;;  %v675_v2 = vpop.eup %674  ;;  %688 = vrcp.f32 %v152_v48 }
  0x3a   :  { %59 = vst.msk [vmem:[#allocation2 + $0x40] sm:$0xff] %vm50_vm1, %v754_v32  ;;  %60 = vst.msk [vmem:[#allocation2 + $0x48] sm:$0xff] %vm50_vm1, %v754_v32  ;;  %v416_v62 = vsel %vm388_vm0, %v355_v50, 0.0  ;;  %v335_v59 = vmul.f32 %v304_v14, %v899_v38  ;;  %v222_v7 = vmul.f32 0.6931472, %v675_v2  ;;  %690 = vrcp.f32 %v153_v56 }
  0x3b   :  { %61 = vst.msk [vmem:[#allocation2 + $0x50] sm:$0xff] %vm50_vm1, %v754_v32  ;;  %62 = vst.msk [vmem:[#allocation2 + $0x58] sm:$0xff] %vm50_vm1, %v754_v32  ;;  %v677_v18 = vpop.eup %676  ;;  %417 = vadd.xlane.f32.xlu1 %v416_v62  ;;  %692 = vrcp.f32 %v154_v55 }
  0x3c   :  { %63 = vst.msk [vmem:[#allocation2 + $0x60] sm:$0xff] %vm50_vm1, %v754_v32  ;;  %64 = vst.msk [vmem:[#allocation2 + $0x68] sm:$0xff] %vm50_vm1, %v754_v32  ;;  %v356_v4 = vadd.f32 %v335_v59, %v251_v54  ;;  %v252_v8 = vmul.f32 %v222_v7, %v904_v39  ;;  %v306_v16 = vmul.f32 0.6931472, %v677_v18  ;;  %694 = vrcp.f32 %v155_v15 }
  0x3d   :  { %65 = vst.msk [vmem:[#allocation2 + $0x70] sm:$0xff] %vm50_vm1, %v754_v32  ;;  %66 = vst.msk [vmem:[#allocation2 + $0x78] sm:$0xff] %vm50_vm1, %v754_v32  ;;  %v679_v34 = vpop.eup %678  ;;  %696 = vrcp.f32 %v156_v36 }
  0x3e   :  { %67 = vst.msk [vmem:[#allocation2 + $0x80] sm:$0xff] %vm50_vm1, %v754_v32  ;;  %68 = vst.msk [vmem:[#allocation2 + $0x88] sm:$0xff] %vm50_vm1, %v754_v32  ;;  %v419_v5 = vsel %vm388_vm0, %v356_v4, 0.0  ;;  %v336_v21 = vmul.f32 %v306_v16, %v909_v40  ;;  %v224_v51 = vmul.f32 0.6931472, %v679_v34 }
  0x3f   :  { %69 = vst.msk [vmem:[#allocation2 + $0x90] sm:$0xff] %vm50_vm1, %v754_v32  ;;  %70 = vst.msk [vmem:[#allocation2 + $0x98] sm:$0xff] %vm50_vm1, %v754_v32  ;;  %v681_v63 = vpop.eup %680  ;;  %420 = vadd.xlane.f32.xlu0 %v419_v5 }
  0x40   :  { %v683_v38 = vpop.eup %682  ;;  %v357_v42 = vadd.f32 %v336_v21, %v252_v8  ;;  %v253_v24 = vmul.f32 %v224_v51, %v918_v44  ;;  %v308_v17 = vmul.f32 0.6931472, %v681_v63  ;;  %72 = vst.msk [vmem:[#allocation2 + $0xa0] sm:$0x3] %vm71_vm3, %v754_v32 }
  0x41   :  { %v685_v20 = vpop.eup %684  ;;  %v191_v39 = vmul.f32 %v683_v38, %v938_v12  ;;  %v275_v25 = vmul.f32 %v683_v38, %v943_v13 }
  0x42   :  { %v687_v26 = vpop.eup %686  ;;  %v422_v6 = vsel %vm388_vm0, %v357_v42, 0.0  ;;  %v337_v40 = vmul.f32 %v308_v17, %v923_v45  ;;  %v192_v29 = vmul.f32 %v685_v20, %v953_v30  ;;  %v276_v9 = vmul.f32 %v685_v20, %v958_v31 }
  0x43   :  { %v689_v52 = vpop.eup %688  ;;  %423 = vadd.xlane.f32.xlu1 %v422_v6  ;;  %698 = vlog2.f32 %v191_v39  ;;  %v193_v44 = vmul.f32 %v687_v26, %v966_v37  ;;  %v277_v56 = vmul.f32 %v687_v26, %v971_v41 }
  0x44   :  { %v691_v53 = vpop.eup %690  ;;  %v358_v48 = vadd.f32 %v337_v40, %v253_v24  ;;  %700 = vlog2.f32 %v275_v25  ;;  %v194_v28 = vmul.f32 %v689_v52, %v979_v46  ;;  %v278_v49 = vmul.f32 %v689_v52, %v984_v47 }
  0x45   :  { %702 = vlog2.f32 %v192_v29  ;;  %v693_v0 = vpop.eup %692  ;;  %v195_v58 = vmul.f32 %v691_v53, %v1259_v10  ;;  %v279_v19 = vmul.f32 %v691_v53, %v1260_v11 }
  0x46   :  { %v425_v45 = vsel %vm388_vm0, %v358_v48, 0.0  ;;  %704 = vlog2.f32 %v276_v9  ;;  %v695_v3 = vpop.eup %694  ;;  %v196_v1 = vmul.f32 %v693_v0, %v1058_v22  ;;  %v280_v33 = vmul.f32 %v693_v0, %v1063_v23 }
  0x47   :  { %426 = vadd.xlane.f32.xlu0 %v425_v45  ;;  %706 = vlog2.f32 %v193_v44  ;;  %v697_v35 = vpop.eup %696  ;;  %v197_v55 = vmul.f32 %v695_v3, %v1074_v43  ;;  %v281_v61 = vmul.f32 %v695_v3, %v1079_v27 }
  0x48   :  { %708 = vlog2.f32 %v277_v56  ;;  %v198_v54 = vmul.f32 %v697_v35, %v1088_v57  ;;  %v282_v15 = vmul.f32 %v697_v35, %v1095_v60 }
  0x49   :  { %710 = vlog2.f32 %v194_v28 }
  0x4a   :  { %712 = vlog2.f32 %v278_v49 }
  0x4b   :  { %714 = vlog2.f32 %v195_v58 }
  0x4c   :  { %716 = vlog2.f32 %v279_v19 }
  0x4d   :  { %v699_v50 = vpop.eup %698  ;;  %718 = vlog2.f32 %v196_v1 }
  0x4e   :  { %v701_v14 = vpop.eup %700  ;;  %v226_v2 = vmul.f32 0.6931472, %v699_v50  ;;  %720 = vlog2.f32 %v280_v33 }
  0x4f   :  { %v703_v62 = vpop.eup %702  ;;  %v310_v59 = vmul.f32 0.6931472, %v701_v14  ;;  %722 = vlog2.f32 %v197_v55 }
  0x50   :  { %v705_v7 = vpop.eup %704  ;;  %v254_v18 = vmul.f32 %v226_v2, %v938_v12  ;;  %v228_v36 = vmul.f32 0.6931472, %v703_v62  ;;  %724 = vlog2.f32 %v281_v61 }
  0x51   :  { %v707_v4 = vpop.eup %706  ;;  %v338_v8 = vmul.f32 %v310_v59, %v943_v13  ;;  %v312_v16 = vmul.f32 0.6931472, %v705_v7  ;;  %726 = vlog2.f32 %v198_v54 }
  0x52   :  { %v709_v34 = vpop.eup %708  ;;  %v255_v5 = vmul.f32 %v228_v36, %v953_v30  ;;  %v230_v21 = vmul.f32 0.6931472, %v707_v4  ;;  %728 = vlog2.f32 %v282_v15  ;;  %v368_v36 = vld [vmem:[#allocation2 + $0x8] sm:$0xff] }
  0x53   :  { %v711_v51 = vpop.eup %710  ;;  %v359_v63 = vadd.f32 %v338_v8, %v254_v18  ;;  %v339_v38 = vmul.f32 %v312_v16, %v958_v31  ;;  %v314_v42 = vmul.f32 0.6931472, %v709_v34  ;;  %v370_v8 = vld [vmem:[#allocation2 + $0x18] sm:$0xff] }
  0x54   :  { %v713_v24 = vpop.eup %712  ;;  %v256_v12 = vmul.f32 %v230_v21, %v966_v37  ;;  %v232_v17 = vmul.f32 0.6931472, %v711_v51  ;;  %v372_v51 = vld [vmem:[#allocation2 + $0x28] sm:$0xff] }
  0x55   :  { %v715_v20 = vpop.eup %714  ;;  %v428_v39 = vsel %vm388_vm0, %v359_v63, 0.0  ;;  %v360_v13 = vadd.f32 %v339_v38, %v255_v5  ;;  %v340_v25 = vmul.f32 %v314_v42, %v971_v41  ;;  %v316_v26 = vmul.f32 0.6931472, %v713_v24  ;;  %v371_v5 = vld [vmem:[#allocation2 + $0x20] sm:$0xff]  ;;  %v373_v42 = vld [vmem:[#allocation2 + $0x30] sm:$0xff] }
  0x56   :  { %v717_v6 = vpop.eup %716  ;;  %429 = vadd.xlane.f32.xlu1 %v428_v39  ;;  %v257_v30 = vmul.f32 %v232_v17, %v979_v46  ;;  %v234_v40 = vmul.f32 0.6931472, %v715_v20  ;;  %v374_v20 = vld [vmem:[#allocation2 + $0x38] sm:$0xff] }
  0x57   :  { %v719_v29 = vpop.eup %718  ;;  %v431_v31 = vsel %vm388_vm0, %v360_v13, 0.0  ;;  %v361_v9 = vadd.f32 %v340_v25, %v256_v12  ;;  %v341_v52 = vmul.f32 %v316_v26, %v984_v47  ;;  %v318_v37 = vmul.f32 0.6931472, %v717_v6  ;;  %v375_v6 = vld [vmem:[#allocation2 + $0x40] sm:$0xff] }
  0x58   :  { %v721_v44 = vpop.eup %720  ;;  %432 = vadd.xlane.f32.xlu0 %v431_v31  ;;  %v258_v53 = vmul.f32 %v234_v40, %v1259_v10  ;;  %v236_v48 = vmul.f32 0.6931472, %v719_v29 }
  0x59   :  { %v723_v56 = vpop.eup %722  ;;  %v434_v41 = vsel %vm388_vm0, %v361_v9, 0.0  ;;  %v362_v28 = vadd.f32 %v341_v52, %v257_v30  ;;  %v342_v0 = vmul.f32 %v318_v37, %v1260_v11  ;;  %v320_v46 = vmul.f32 0.6931472, %v721_v44 }
  0x5a   :  { %v725_v45 = vpop.eup %724  ;;  %435 = vadd.xlane.f32.xlu1 %v434_v41  ;;  %v259_v49 = vmul.f32 %v236_v48, %v1058_v22  ;;  %v238_v58 = vmul.f32 0.6931472, %v723_v56  ;;  %v376_v48 = vld [vmem:[#allocation2 + $0x48] sm:$0xff] }
  0x5b   :  { %v727_v3 = vpop.eup %726  ;;  %v437_v47 = vsel %vm388_vm0, %v362_v28, 0.0  ;;  %v363_v19 = vadd.f32 %v342_v0, %v258_v53  ;;  %v343_v1 = vmul.f32 %v320_v46, %v1063_v23  ;;  %v322_v10 = vmul.f32 0.6931472, %v725_v45 }
  0x5c   :  { %v729_v35 = vpop.eup %728  ;;  %438 = vadd.xlane.f32.xlu0 %v437_v47  ;;  %v260_v33 = vmul.f32 %v238_v58, %v1074_v43  ;;  %v240_v55 = vmul.f32 0.6931472, %v727_v3  ;;  %v377_v58 = vld [vmem:[#allocation2 + $0x50] sm:$0xff] }
  0x5d   :  { %v440_v11 = vsel %vm388_vm0, %v363_v19, 0.0  ;;  %v364_v61 = vadd.f32 %v343_v1, %v259_v49  ;;  %v344_v50 = vmul.f32 %v322_v10, %v1079_v27  ;;  %v324_v54 = vmul.f32 0.6931472, %v729_v35  ;;  %v367_v27 = vld [vmem:[#allocation2] sm:$0xff]  ;;  %v378_v35 = vld [vmem:[#allocation2 + $0x58] sm:$0xff] }
  0x5e   :  { %441 = vadd.xlane.f32.xlu1 %v440_v11  ;;  %v261_v22 = vmul.f32 %v240_v55, %v1088_v57  ;;  %v369_v57 = vld [vmem:[#allocation2 + $0x10] sm:$0xff] }
  0x5f   :  { %v443_v14 = vsel %vm388_vm0, %v364_v61, 0.0  ;;  %v365_v2 = vadd.f32 %v344_v50, %v260_v33  ;;  %v345_v23 = vmul.f32 %v324_v54, %v1095_v60  ;;  %v379_v54 = vld [vmem:[#allocation2 + $0x60] sm:$0xff] }
  0x60   :  { %444 = vadd.xlane.f32.xlu0 %v443_v14 }
  0x61   :  { %v446_v15 = vsel %vm388_vm0, %v365_v2, 0.0  ;;  %v366_v43 = vadd.f32 %v345_v23, %v261_v22 }
  0x62   :  { %447 = vadd.xlane.f32.xlu1 %v446_v15 }
  0x63   :  { %v450_v62 = vsel %vm449_vm2, %v366_v43, 0.0 }
  0x64   :  { %451 = vadd.xlane.f32.xlu0 %v450_v62 }
  0xb4   :  { %v391_v59 = vpop.xlane.xlu0 %390 }
  0xb5   :  { %v453_v7 = vadd.f32 %v391_v59, %v367_v27 }
  0xb6   :  { %v397_v18 = vpop.xlane.xlu1 %396 }
  0xb7   :  { %475 = vst.msk [vmem:[#allocation2] sm:$0xff] %vm50_vm1, %v453_v7  ;;  %v455_v60 = vadd.f32 %v397_v18, %v369_v57 }
  0xb8   :  { %v394_v4 = vpop.xlane.xlu0 %393 }
  0xb9   :  { %477 = vst.msk [vmem:[#allocation2 + $0x10] sm:$0xff] %vm50_vm1, %v455_v60  ;;  %v454_v16 = vadd.f32 %v394_v4, %v368_v36  ;;  %v380_v60 = vld [vmem:[#allocation2 + $0x68] sm:$0xff] }
  0xba   :  { %v400_v34 = vpop.xlane.xlu1 %399 }
  0xbb   :  { %476 = vst.msk [vmem:[#allocation2 + $0x8] sm:$0xff] %vm50_vm1, %v454_v16  ;;  %v456_v21 = vadd.f32 %v400_v34, %v370_v8  ;;  %v381_v16 = vld [vmem:[#allocation2 + $0x70] sm:$0xff] }
  0xbc   :  { %v403_v32 = vpop.xlane.xlu0 %402 }
  0xbd   :  { %478 = vst.msk [vmem:[#allocation2 + $0x18] sm:$0xff] %vm50_vm1, %v456_v21  ;;  %v457_v63 = vadd.f32 %v403_v32, %v371_v5 }
  0xbe   :  { %v406_v38 = vpop.xlane.xlu1 %405  ;;  %v500_v12 = vld [vmem:[#allocation2] sm:$0xff] }
  0xbf   :  { %479 = vst.msk [vmem:[#allocation2 + $0x20] sm:$0xff] %vm50_vm1, %v457_v63  ;;  %v458_v24 = vadd.f32 %v406_v38, %v372_v51  ;;  %v521_v30 = vsel %vm50_vm1, %v500_v12, 0.0  ;;  %v382_v51 = vld [vmem:[#allocation2 + $0x78] sm:$0xff] }
  0xc0   :  { %v409_v17 = vpop.xlane.xlu0 %408  ;;  %v502_v13 = vld [vmem:[#allocation2 + $0x10] sm:$0xff] }
  0xc1   :  { %480 = vst.msk [vmem:[#allocation2 + $0x28] sm:$0xff] %vm50_vm1, %v458_v24  ;;  %v459_v39 = vadd.f32 %v409_v17, %v373_v42  ;;  %v524_v44 = vsel %vm50_vm1, %v502_v13, 0.0  ;;  %v383_v24 = vld [vmem:[#allocation2 + $0x80] sm:$0xff]  ;;  %v384_v13 = vld [vmem:[#allocation2 + $0x88] sm:$0xff] }
  0xc2   :  { %v501_v25 = vld [vmem:[#allocation2 + $0x8] sm:$0xff]  ;;  %v412_v26 = vpop.xlane.xlu1 %411 }
  0xc3   :  { %v522_v40 = vsel %vm50_vm1, %v501_v25, 0.0  ;;  %481 = vst.msk [vmem:[#allocation2 + $0x30] sm:$0xff] %vm50_vm1, %v459_v39  ;;  %v460_v29 = vadd.f32 %v412_v26, %v374_v20 }
  0xc4   :  { %v415_v31 = vpop.xlane.xlu0 %414  ;;  %v503_v9 = vld [vmem:[#allocation2 + $0x18] sm:$0xff]  ;;  %v523_v52 = vadd.f32 %v522_v40, %v521_v30 }
  0xc5   :  { %482 = vst.msk [vmem:[#allocation2 + $0x38] sm:$0xff] %vm50_vm1, %v460_v29  ;;  %v461_v37 = vadd.f32 %v415_v31, %v375_v6  ;;  %v526_v53 = vsel %vm50_vm1, %v503_v9, 0.0  ;;  %v385_v6 = vld [vmem:[#allocation2 + $0x90] sm:$0xff]  ;;  %v386_v31 = vld [vmem:[#allocation2 + $0x98] sm:$0xff] }
  0xc6   :  { %v504_v56 = vld [vmem:[#allocation2 + $0x20] sm:$0xff]  ;;  %v525_v41 = vadd.f32 %v524_v44, %v523_v52 }
  0xc7   :  { %483 = vst.msk [vmem:[#allocation2 + $0x40] sm:$0xff] %vm50_vm1, %v461_v37  ;;  %v528_v46 = vsel %vm50_vm1, %v504_v56, 0.0 }
  0xc8   :  { %v418_v28 = vpop.xlane.xlu1 %417  ;;  %v527_v0 = vadd.f32 %v526_v53, %v525_v41  ;;  %v505_v49 = vld [vmem:[#allocation2 + $0x28] sm:$0xff]  ;;  %v387_v53 = vld [vmem:[#allocation2 + $0xa0] sm:$0x3] }
  0xc9   :  { %v462_v45 = vadd.f32 %v418_v28, %v376_v48  ;;  %v530_v19 = vsel %vm50_vm1, %v505_v49, 0.0 }
  0xca   :  { %v529_v3 = vadd.f32 %v528_v46, %v527_v0  ;;  %v506_v10 = vld [vmem:[#allocation2 + $0x30] sm:$0xff] }
  0xcb   :  { %484 = vst.msk [vmem:[#allocation2 + $0x48] sm:$0xff] %vm50_vm1, %v462_v45  ;;  %v532_v11 = vsel %vm50_vm1, %v506_v10, 0.0 }
  0xcc   :  { %v421_v47 = vpop.xlane.xlu0 %420  ;;  %v531_v33 = vadd.f32 %v530_v19, %v529_v3  ;;  %v507_v50 = vld [vmem:[#allocation2 + $0x38] sm:$0xff] }
  0xcd   :  { %v463_v1 = vadd.f32 %v421_v47, %v377_v58  ;;  %v534_v2 = vsel %vm50_vm1, %v507_v50, 0.0 }
  0xce   :  { %v533_v22 = vadd.f32 %v532_v11, %v531_v33  ;;  %v508_v15 = vld [vmem:[#allocation2 + $0x40] sm:$0xff] }
  0xcf   :  { %485 = vst.msk [vmem:[#allocation2 + $0x50] sm:$0xff] %vm50_vm1, %v463_v1  ;;  %v536_v62 = vsel %vm50_vm1, %v508_v15, 0.0 }
  0xd0   :  { %v424_v55 = vpop.xlane.xlu1 %423  ;;  %v535_v43 = vadd.f32 %v534_v2, %v533_v22 }
  0xd1   :  { %v464_v61 = vadd.f32 %v424_v55, %v378_v35 }
  0xd2   :  { %v509_v27 = vld [vmem:[#allocation2 + $0x48] sm:$0xff]  ;;  %v537_v59 = vadd.f32 %v536_v62, %v535_v43 }
  0xd3   :  { %486 = vst.msk [vmem:[#allocation2 + $0x58] sm:$0xff] %vm50_vm1, %v464_v61  ;;  %v538_v57 = vsel %vm50_vm1, %v509_v27, 0.0 }
  0xd4   :  { %v427_v14 = vpop.xlane.xlu0 %426  ;;  %v539_v18 = vadd.f32 %v538_v57, %v537_v59 }
  0xd5   :  { %v465_v23 = vadd.f32 %v427_v14, %v379_v54 }
  0xd6   :  { %v510_v7 = vld [vmem:[#allocation2 + $0x50] sm:$0xff] }
  0xd7   :  { %487 = vst.msk [vmem:[#allocation2 + $0x60] sm:$0xff] %vm50_vm1, %v465_v23  ;;  %v540_v36 = vsel %vm50_vm1, %v510_v7, 0.0 }
  0xd8   :  { %v541_v34 = vadd.f32 %v540_v36, %v539_v18 }
  0xda   :  { %v511_v4 = vld [vmem:[#allocation2 + $0x58] sm:$0xff] }
  0xdb   :  { %v542_v21 = vsel %vm50_vm1, %v511_v4, 0.0 }
  0xdc   :  { %v543_v12 = vadd.f32 %v542_v21, %v541_v34 }
  0xde   :  { %v512_v63 = vld [vmem:[#allocation2 + $0x60] sm:$0xff] }
  0xdf   :  { %v544_v20 = vsel %vm50_vm1, %v512_v63, 0.0 }
  0xe0   :  { %v545_v30 = vadd.f32 %v544_v20, %v543_v12 }
  0xe3   :  { %v430_v8 = vpop.xlane.xlu1 %429 }
  0xe4   :  { %v466_v5 = vadd.f32 %v430_v8, %v380_v60 }
  0xe5   :  { %v433_v32 = vpop.xlane.xlu0 %432 }
  0xe6   :  { %488 = vst.msk [vmem:[#allocation2 + $0x68] sm:$0xff] %vm50_vm1, %v466_v5  ;;  %v467_v38 = vadd.f32 %v433_v32, %v381_v16 }
  0xe7   :  { %v436_v42 = vpop.xlane.xlu1 %435 }
  0xe8   :  { %489 = vst.msk [vmem:[#allocation2 + $0x70] sm:$0xff] %vm50_vm1, %v467_v38  ;;  %v468_v17 = vadd.f32 %v436_v42, %v382_v51 }
  0xe9   :  { %v439_v39 = vpop.xlane.xlu0 %438 }
  0xea   :  { %490 = vst.msk [vmem:[#allocation2 + $0x78] sm:$0xff] %vm50_vm1, %v468_v17  ;;  %v469_v25 = vadd.f32 %v439_v39, %v383_v24 }
  0xeb   :  { %v442_v26 = vpop.xlane.xlu1 %441 }
  0xec   :  { %491 = vst.msk [vmem:[#allocation2 + $0x80] sm:$0xff] %vm50_vm1, %v469_v25  ;;  %v470_v40 = vadd.f32 %v442_v26, %v384_v13 }
  0xed   :  { %v445_v29 = vpop.xlane.xlu0 %444  ;;  %v513_v9 = vld [vmem:[#allocation2 + $0x68] sm:$0xff] }
  0xee   :  { %492 = vst.msk [vmem:[#allocation2 + $0x88] sm:$0xff] %vm50_vm1, %v470_v40  ;;  %v471_v52 = vadd.f32 %v445_v29, %v385_v6  ;;  %v546_v37 = vsel %vm50_vm1, %v513_v9, 0.0 }
  0xef   :  { %v448_v44 = vpop.xlane.xlu1 %447  ;;  %v514_v48 = vld [vmem:[#allocation2 + $0x70] sm:$0xff]  ;;  %v547_v56 = vadd.f32 %v546_v37, %v545_v30 }
  0xf0   :  { %493 = vst.msk [vmem:[#allocation2 + $0x90] sm:$0xff] %vm50_vm1, %v471_v52  ;;  %v472_v41 = vadd.f32 %v448_v44, %v386_v31  ;;  %v548_v28 = vsel %vm50_vm1, %v514_v48, 0.0 }
  0xf1   :  { %v452_v0 = vpop.xlane.xlu0 %451  ;;  %v515_v46 = vld [vmem:[#allocation2 + $0x78] sm:$0xff]  ;;  %v549_v45 = vadd.f32 %v548_v28, %v547_v56 }
  0xf2   :  { %494 = vst.msk [vmem:[#allocation2 + $0x98] sm:$0xff] %vm50_vm1, %v472_v41  ;;  %v473_v49 = vadd.f32 %v452_v0, %v387_v53  ;;  %v550_v58 = vsel %vm50_vm1, %v515_v46, 0.0 }
  0xf3   :  { %v516_v3 = vld [vmem:[#allocation2 + $0x80] sm:$0xff]  ;;  %v551_v47 = vadd.f32 %v550_v58, %v549_v45 }
  0xf4   :  { %496 = vst.msk [vmem:[#allocation2 + $0xa0] sm:$0x3] %vm71_vm3, %v473_v49  ;;  %v552_v19 = vsel %vm50_vm1, %v516_v3, 0.0 }
  0xf5   :  { %v517_v1 = vld [vmem:[#allocation2 + $0x88] sm:$0xff]  ;;  %v553_v10 = vadd.f32 %v552_v19, %v551_v47 }
  0xf6   :  { %v554_v35 = vsel %vm50_vm1, %v517_v1, 0.0 }
  0xf7   :  { %v518_v33 = vld [vmem:[#allocation2 + $0x90] sm:$0xff]  ;;  %v555_v55 = vadd.f32 %v554_v35, %v553_v10 }
  0xf8   :  { %v556_v11 = vsel %vm50_vm1, %v518_v33, 0.0 }
  0xf9   :  { %v519_v61 = vld [vmem:[#allocation2 + $0x98] sm:$0xff]  ;;  %v557_v50 = vadd.f32 %v556_v11, %v555_v55 }
  0xfa   :  { %v558_v54 = vsel %vm50_vm1, %v519_v61, 0.0 }
  0xfb   :  { %v520_v22 = vld [vmem:[#allocation2 + $0xa0] sm:$0x3]  ;;  %v559_v14 = vadd.f32 %v558_v54, %v557_v50 }
  0xfc   :  { %v560_v2 = vsel %vm71_vm3, %v520_v22, 0.0 }
  0xfd   :  { %v561_v23 = vadd.f32 %v560_v2, %v559_v14 }
  0xff   :  { %562 = vadd.xlane.f32.xlu1 %v561_v23 }
 0x18c   :  { %v563_v15 = vpop.xlane.xlu1 %562 }
 0x18d   :  { %v564_v43 = vrot.slane %v563_v15, 4 }
 0x18f   :  { %v565_v62 = vadd.f32 %v564_v43, %v563_v15 }
 0x191   :  { %v566_v27 = vrot.slane %v565_v62, 2 }
 0x193   :  { %v567_v59 = vadd.f32 %v566_v27, %v565_v62 }
 0x195   :  { %v568_v57 = vrot.slane %v567_v59, 1 }
 0x197   :  { %v569_v7 = vadd.f32 %v568_v57, %v567_v59 }
 0x199   :  { %600 = vpush %v569_v7 }
 0x1ca   :  { %s601_s9 = spop %600 }
 0x1cb   :  { %s571_s10 = smul.f32 0.5, %s601_s9 }
 0x1cd   :  { %v572_v18 = vstv %s571_s10 }
 0x1ce   :  { %573 = vst [vmem:[#allocation3] sm:$0xff] %v572_v18 }
 0x1cf   :  { %741 = shalt.err (!%p738_p4)
}
 0x1d0   :  { %s742_s14 = scalar_lea.hbm %s1252_s2, 128 }
 0x1d1   :  { %p743_p5 = scmp.ne.s32.totalorder %s1252_s2, %s742_s14  ;;  %p746_p6 = scmp.lt.u32.totalorder %s742_s14, %s1252_s2 }
 0x1d3   :  { %p748_p7 = pnand %p746_p6, %p743_p5 }
 0x1d5   :  { %751 = shalt.err (!%p748_p7)
}
 0x1d6   :  { %583 = dma.vmem_to_hbm [thread:$0]  %s581_s1, 128, %s1252_s2, [#allocation4]  }
 0x1d7   :  { %752 = dma.done.wait [#allocation4], 128  }
 0x1d8   :  { %753 = vsyncadd [#allocation4], 4294967168 }
 0x1d9   :  { %587 = vsyncpa [#allocation4], 1 }

</bundles_post_ra>
